<compile_context>
chip_gen: v5e
topology: v5e:2x2
jax: 0.10.0
libtpu: 0.0.40
codegen_flags: <defaults>
</compile_context>

<pallas_src>
import numpy as np
import jax
import jax.numpy as jnp
from jax.experimental import pallas as pl
from jax.experimental.pallas import tpu as pltpu


# ----------------------------------------------------------------------------
# small helpers / generation-aware tiling config
# ----------------------------------------------------------------------------
def _round_up(x, m):
    return (x + m - 1) // m * m


def _tpu_vmem_capacity_bytes():
    try:
        info = pltpu.get_tpu_info()
        cap = getattr(info, "vmem_capacity_bytes", None)
        if cap:
            return int(cap)
    except Exception:
        pass
    return 64 << 20  # conservative default: v7x-sized VMEM


_VMEM_CAP = _tpu_vmem_capacity_bytes()
# scoped limit ~half of physical so double-buffered pipelines have headroom
_VMEM_LIMIT = int(min(max(_VMEM_CAP // 2, 16 << 20), 64 << 20))
# bigger row tiles on 128 MiB parts (v5e/v6e), smaller on 64 MiB v7x
_DEF_TM = 1024 if _VMEM_CAP >= (96 << 20) else 512


def _mosaic(dims):
    return pltpu.CompilerParams(dimension_semantics=dims,
                                vmem_limit_bytes=_VMEM_LIMIT)


def _choose_block_m(Mp, tm, lane_n=128, out_bytes=4):
    """Row-tile size: <= tm, VMEM-budgeted against the output width, split into
    >=2 grid steps when rows allow so both v7x TensorCores get work."""
    budget = _VMEM_LIMIT // 4
    cap = max(16, (budget // max(lane_n * out_bytes * 2, 1)) // 16 * 16)
    tm = max(16, min(tm, cap))
    if Mp > tm:
        return tm
    if Mp >= 32:
        return max(16, _round_up(pl.cdiv(Mp, 2), 16))
    return Mp  # tiny: single full-extent block (always a legal block shape)


# ----------------------------------------------------------------------------
# Pallas kernels
# ----------------------------------------------------------------------------
def _linear_kernel(x_ref, w_ref, b_ref, o_ref):
    y = jnp.dot(x_ref[...], w_ref[...], preferred_element_type=jnp.float32)
    o_ref[...] = (y + b_ref[...]).astype(o_ref.dtype)


def _linear_relu_kernel(x_ref, w_ref, b_ref, o_ref):
    y = jnp.dot(x_ref[...], w_ref[...], preferred_element_type=jnp.float32)
    o_ref[...] = jnp.maximum(y + b_ref[...], 0.0).astype(o_ref.dtype)


def _embed_neck_kernel(x_ref, w1_ref, b1_ref, w2_ref, b2_ref, o_ref):
    # fused: (normalized) patch-embed + relu -> neck 1x1 conv + relu
    # (mean/std are folded into w1/b1; intermediate h never leaves VMEM)
    h = jnp.dot(x_ref[...], w1_ref[...], preferred_element_type=jnp.float32)
    h = jnp.maximum(h + b1_ref[...], 0.0).astype(jnp.bfloat16)
    y = jnp.dot(h, w2_ref[...], preferred_element_type=jnp.float32)
    o_ref[...] = jnp.maximum(y + b2_ref[...], 0.0).astype(o_ref.dtype)


def _query_kernel(x_ref, wq_ref, bq_ref, wh_ref, bh_ref, q_ref, heads_ref):
    # fused: q2d = relu(x @ W_q + b); heads = q2d @ [W_maskI|W_score|W_bboxI]
    q2d = jnp.dot(x_ref[...], wq_ref[...], preferred_element_type=jnp.float32)
    q2d = jnp.maximum(q2d + bq_ref[...], 0.0)
    q_ref[...] = q2d.astype(q_ref.dtype)
    heads = jnp.dot(q2d.astype(jnp.bfloat16), wh_ref[...],
                    preferred_element_type=jnp.float32) + bh_ref[...]
    heads_ref[...] = heads.astype(heads_ref.dtype)


def _make_actor_kernel(pai_off, C):
    # fused actor-interaction + pose-shift chain over the hit-query rows:
    #   h = relu(x @ W_a + b_a)
    #   heads = h @ [W_hm | W_maskJ | W_pai | W_kp | W_bboxJ] + b
    #   pm = (pai + h) @ W_part
    #   ranks = pai @ W_rank_pad + b_rank_pad   (lane-padded, -inf pad bias)
    #   rank_scores = sum(softmax(ranks) * rank_weights)
    def kernel(x_ref, wa_ref, ba_ref, wh_ref, bh_ref, wp_ref, wr_ref, br_ref,
               rw_ref, heads_ref, pm_ref, ranks_ref, rs_ref):
        h = jnp.dot(x_ref[...], wa_ref[...], preferred_element_type=jnp.float32)
        h = jnp.maximum(h + ba_ref[...], 0.0)
        heads = jnp.dot(h.astype(jnp.bfloat16), wh_ref[...],
                        preferred_element_type=jnp.float32) + bh_ref[...]
        heads_ref[...] = heads.astype(heads_ref.dtype)
        pai = heads[:, pai_off:pai_off + C]          # 128-aligned static slice
        pm = jnp.dot((pai + h).astype(jnp.bfloat16), wp_ref[...],
                     preferred_element_type=jnp.float32)
        pm_ref[...] = pm.astype(pm_ref.dtype)
        ranks = jnp.dot(pai.astype(jnp.bfloat16), wr_ref[...],
                        preferred_element_type=jnp.float32) + br_ref[...]
        ranks_ref[...] = ranks
        m = jnp.max(ranks, axis=-1, keepdims=True)
        e = jnp.exp(ranks - m)
        p = e / jnp.sum(e, axis=-1, keepdims=True)   # exact softmax
        rs_ref[...] = jnp.sum(p * rw_ref[...], axis=-1, keepdims=True)
    return kernel


def _bmm_nt_kernel(a_ref, f_ref, o_ref):
    # per-batch (M, C) @ (Nt, C)^T -> (M, Nt); contracts the channel axis so
    # the feature map never needs a (B, C, HW) transpose.
    o_ref[0] = jax.lax.dot_general(
        a_ref[0], f_ref[0],
        dimension_numbers=(((1,), (1,)), ((), ())),
        preferred_element_type=jnp.float32)


def _softmax_kernel(x_ref, o_ref):
    x = x_ref[...]
    m = jnp.max(x, axis=-1, keepdims=True)
    e = jnp.exp(x - m)
    o_ref[...] = e / jnp.sum(e, axis=-1, keepdims=True)


# ----------------------------------------------------------------------------
# Pallas wrappers
# ----------------------------------------------------------------------------
def pallas_linear(x, w, b=None, relu=False, out_dtype=jnp.float32, tm=None):
    """Row-tiled y = x @ w + b; bf16 matmul inputs, f32 accumulation."""
    M, K = x.shape
    N = w.shape[1]
    x = x.astype(jnp.bfloat16)
    w = w.astype(jnp.bfloat16)
    if b is None:
        b = jnp.zeros((1, N), jnp.float32)
    b = jnp.reshape(b, (1, N)).astype(jnp.float32)
    Mp = _round_up(M, 8)
    if Mp != M:
        x = jnp.pad(x, ((0, Mp - M), (0, 0)))
    block_m = _choose_block_m(Mp, tm or _DEF_TM, lane_n=max(N, 128))
    grid_m = pl.cdiv(Mp, block_m)
    kern = _linear_relu_kernel if relu else _linear_kernel
    out = pl.pallas_call(
        kern,
        out_shape=jax.ShapeDtypeStruct((Mp, N), out_dtype),
        grid=(grid_m,),
        in_specs=[pl.BlockSpec((block_m, K), lambda i: (i, 0)),
                  pl.BlockSpec((K, N), lambda i: (0, 0)),
                  pl.BlockSpec((1, N), lambda i: (0, 0))],
        out_specs=pl.BlockSpec((block_m, N), lambda i: (i, 0)),
        compiler_params=_mosaic(("parallel",)),
    )(x, w, b)
    return out[:M] if Mp != M else out


def pallas_embed_neck(x, w1, b1, w2, b2, out_dtype=jnp.bfloat16, tm=None):
    """Fused patch-embed (mean/std folded into w1/b1) + relu + neck + relu.
    The (block_m, C) intermediate stays in VMEM; emits bf16 activations."""
    M, Kp = x.shape
    C1 = w1.shape[1]
    C = w2.shape[1]
    x = x.astype(jnp.bfloat16)
    Mp = _round_up(M, 8)
    if Mp != M:
        x = jnp.pad(x, ((0, Mp - M), (0, 0)))
    block_m = _choose_block_m(Mp, tm or _DEF_TM, lane_n=max(C, 128))
    grid_m = pl.cdiv(Mp, block_m)
    out = pl.pallas_call(
        _embed_neck_kernel,
        out_shape=jax.ShapeDtypeStruct((Mp, C), out_dtype),
        grid=(grid_m,),
        in_specs=[pl.BlockSpec((block_m, Kp), lambda i: (i, 0)),
                  pl.BlockSpec((Kp, C1), lambda i: (0, 0)),
                  pl.BlockSpec((1, C1), lambda i: (0, 0)),
                  pl.BlockSpec((C1, C), lambda i: (0, 0)),
                  pl.BlockSpec((1, C), lambda i: (0, 0))],
        out_specs=pl.BlockSpec((block_m, C), lambda i: (i, 0)),
        compiler_params=_mosaic(("parallel",)),
    )(x, w1.astype(jnp.bfloat16), b1.astype(jnp.float32),
      w2.astype(jnp.bfloat16), b2.astype(jnp.float32))
    return out[:M] if Mp != M else out


def pallas_query_heads(x, wq, bq, wh, bh):
    """Fused: q2d = relu(x @ W_q + b); heads = q2d @ [maskI|score|bboxI]."""
    M, C = x.shape
    Nh = wh.shape[1]
    Mp = _round_up(M, 8)
    x = x.astype(jnp.bfloat16)
    if Mp != M:
        x = jnp.pad(x, ((0, Mp - M), (0, 0)))
    q_out, h_out = pl.pallas_call(
        _query_kernel,
        out_shape=(jax.ShapeDtypeStruct((Mp, C), jnp.bfloat16),
                   jax.ShapeDtypeStruct((Mp, Nh), jnp.float32)),
        grid=(1,),
        in_specs=[pl.BlockSpec((Mp, C), lambda i: (0, 0)),
                  pl.BlockSpec((C, C), lambda i: (0, 0)),
                  pl.BlockSpec((1, C), lambda i: (0, 0)),
                  pl.BlockSpec((C, Nh), lambda i: (0, 0)),
                  pl.BlockSpec((1, Nh), lambda i: (0, 0))],
        out_specs=(pl.BlockSpec((Mp, C), lambda i: (0, 0)),
                   pl.BlockSpec((Mp, Nh), lambda i: (0, 0))),
        compiler_params=_mosaic(("arbitrary",)),
    )(x, wq, bq, wh, bh)
    return q_out[:M], h_out[:M]


def pallas_actor_pose(x, wa, ba, wh, bh, wpart, wrank, brank, rank_weights,
                      pai_off, C):
    """One fused kernel over the hit-query rows: actor-interaction linear, all
    five heads, pose-shift partition head, rank head and rank scores."""
    M = x.shape[0]
    Nh = wh.shape[1]
    Rp = wrank.shape[1]
    Mp = _round_up(M, 8)
    x = x.astype(jnp.bfloat16)
    if Mp != M:
        x = jnp.pad(x, ((0, Mp - M), (0, 0)))
    kernel = _make_actor_kernel(pai_off, C)
    heads, pm, ranks, rs = pl.pallas_call(
        kernel,
        out_shape=(jax.ShapeDtypeStruct((Mp, Nh), jnp.bfloat16),
                   jax.ShapeDtypeStruct((Mp, C), jnp.bfloat16),
                   jax.ShapeDtypeStruct((Mp, Rp), jnp.float32),
                   jax.ShapeDtypeStruct((Mp, 1), jnp.float32)),
        grid=(1,),
        in_specs=[pl.BlockSpec((Mp, C), lambda i: (0, 0)),
                  pl.BlockSpec((C, C), lambda i: (0, 0)),
                  pl.BlockSpec((1, C), lambda i: (0, 0)),
                  pl.BlockSpec((C, Nh), lambda i: (0, 0)),
                  pl.BlockSpec((1, Nh), lambda i: (0, 0)),
                  pl.BlockSpec((C, C), lambda i: (0, 0)),
                  pl.BlockSpec((C, Rp), lambda i: (0, 0)),
                  pl.BlockSpec((1, Rp), lambda i: (0, 0)),
                  pl.BlockSpec((1, Rp), lambda i: (0, 0))],
        out_specs=(pl.BlockSpec((Mp, Nh), lambda i: (0, 0)),
                   pl.BlockSpec((Mp, C), lambda i: (0, 0)),
                   pl.BlockSpec((Mp, Rp), lambda i: (0, 0)),
                   pl.BlockSpec((Mp, 1), lambda i: (0, 0))),
        compiler_params=_mosaic(("arbitrary",)),
    )(x, wa, ba, wh, bh, wpart, wrank, brank, rank_weights)
    return heads[:M], pm[:M], ranks[:M], rs[:M]


def pallas_bmm_nt(a, f, tn=2048):
    """Batched A @ F^T contracting the channel axis: (B,M,C)x(B,N,C)->(B,M,N)."""
    a = a.astype(jnp.bfloat16)
    f = f.astype(jnp.bfloat16)
    B, M, C = a.shape
    _, N, _ = f.shape
    Mp = _round_up(M, 8)
    if Mp != M:
        a = jnp.pad(a, ((0, 0), (0, Mp - M), (0, 0)))
    if N <= 256:
        block_n = N
    else:
        block_n = max(128, min(tn, N) // 128 * 128)
        if B * pl.cdiv(N, block_n) < 2:          # keep v7x's 2nd core busy
            block_n = max(128, _round_up(pl.cdiv(N, 2), 128))
    grid_n = pl.cdiv(N, block_n)
    out = pl.pallas_call(
        _bmm_nt_kernel,
        out_shape=jax.ShapeDtypeStruct((B, Mp, N), jnp.float32),
        grid=(B, grid_n),
        in_specs=[pl.BlockSpec((1, Mp, C), lambda b, j: (b, 0, 0)),
                  pl.BlockSpec((1, block_n, C), lambda b, j: (b, j, 0))],
        out_specs=pl.BlockSpec((1, Mp, block_n), lambda b, j: (b, 0, j)),
        compiler_params=_mosaic(("parallel", "parallel")),
    )(a, f)
    return out[:, :M] if Mp != M else out


def pallas_softmax_rows(x):
    """Row-wise softmax tiled over rows; budgets input+output double buffers."""
    M, N = x.shape
    x = x.astype(jnp.float32)
    per_row = N * 4 * 2 * 2                       # in + out, double buffered
    budget = max(_VMEM_LIMIT // 2, 4 << 20)
    max_rows = (budget // per_row) // 8 * 8
    if max_rows < 8:
        # TODO(synk): lane-tiled online softmax for very wide rows; XLA fallback
        return jax.nn.softmax(x, axis=-1)
    Mp = _round_up(M, 8)
    if Mp != M:
        x = jnp.pad(x, ((0, Mp - M), (0, 0)))
    block_m = min(_DEF_TM, max_rows, Mp)
    if Mp >= 16 and pl.cdiv(Mp, block_m) < 2:     # >=2 steps -> both v7x cores
        block_m = _round_up(pl.cdiv(Mp, 2), 8)
    grid_m = pl.cdiv(Mp, block_m)
    out = pl.pallas_call(
        _softmax_kernel,
        out_shape=jax.ShapeDtypeStruct((Mp, N), jnp.float32),
        grid=(grid_m,),
        in_specs=[pl.BlockSpec((block_m, N), lambda i: (i, 0))],
        out_specs=pl.BlockSpec((block_m, N), lambda i: (i, 0)),
        compiler_params=_mosaic(("parallel",)),
    )(x)
    return out[:M] if Mp != M else out


# ----------------------------------------------------------------------------
# Glue helpers (no clean Pallas equivalent / pure plumbing)
# ----------------------------------------------------------------------------
def sine_position_embedding_hwc(C, Hf, Wf):
    # PositionEmbeddingSine(C//2, normalize=True) -> tokens-major (Hf*Wf, C)
    npos = C // 2
    y = (jnp.arange(Hf, dtype=jnp.float32) + 1.0) / Hf * 2.0 * jnp.pi
    x = (jnp.arange(Wf, dtype=jnp.float32) + 1.0) / Wf * 2.0 * jnp.pi
    dim_t = 10000.0 ** (2.0 * (jnp.arange(npos) // 2) / npos)
    px = x[:, None] / dim_t[None, :]
    py = y[:, None] / dim_t[None, :]
    px = jnp.stack([jnp.sin(px[:, 0::2]), jnp.cos(px[:, 1::2])], axis=2).reshape(Wf, -1)
    py = jnp.stack([jnp.sin(py[:, 0::2]), jnp.cos(py[:, 1::2])], axis=2).reshape(Hf, -1)
    pe = jnp.concatenate(
        [jnp.broadcast_to(py[:, None, :], (Hf, Wf, npos)),
         jnp.broadcast_to(px[None, :, :], (Hf, Wf, npos))], axis=-1)
    return pe.reshape(Hf * Wf, C)


def bilinear_resize(x, out_hw):
    # TODO(synk): torch F.interpolate(align_corners=False) glue via jax.image.resize
    out_shape = x.shape[:-2] + tuple(out_hw)
    return jax.image.resize(x, out_shape, method="linear")


def heatmap_argmax_coords(hm, H, W):
    """Device-side replica of the per-heatmap argmax in the reference loop."""
    row_max = jnp.max(hm, axis=-1)                          # (..., H)
    row_idx = jnp.argmax(hm, axis=-1)                       # (..., H)
    map_idx = jnp.argmax(row_max, axis=-1)                  # (...)
    y = map_idx.astype(jnp.float32) / H
    x_idx = jnp.take_along_axis(row_idx, map_idx[..., None], axis=-1)[..., 0]
    x = x_idx.astype(jnp.float32) / W
    return jnp.stack([x, y], axis=-1)                       # (..., 2)


def xyhw2xyxy(box):
    # TODO(synk): exact box convention of the original repo unknown; assume
    # (cx, cy, h, w) center format.
    x, y, h, w = box[..., 0], box[..., 1], box[..., 2], box[..., 3]
    return np.stack([x - 0.5 * w, y - 0.5 * h, x + 0.5 * w, y + 0.5 * h], axis=-1)


def arange_from_ascending_seq(bi):
    out = np.zeros_like(bi)
    counts = {}
    for idx, b in enumerate(bi):
        c = counts.get(int(b), 0)
        out[idx] = c
        counts[int(b)] = c + 1
    return out


def get_rank_weights(max_rank_level):
    w = 1.0 / (np.arange(max_rank_level, dtype=np.float32) + 1e-6)
    w[0] = 0.0
    return w


def post_process_one(result, maskness_threshold):
    masks = result['masks']
    scores = result['scores']
    n = result['num']
    iskeep = [True for _ in range(n)]
    for i in range(n):
        if iskeep[i] is False:
            continue
        for j in range(i + 1, n):
            if iskeep[j] is False:
                continue
            maskness = (masks[i] * masks[j]).sum() / min(masks[i].sum() + 1e-06,
                                                         masks[j].sum() + 1e-06)
            objectness = scores[i] + scores[j]
            tolerance = 1.0 - maskness
            if maskness > maskness_threshold and objectness < 2.0 - tolerance:
                masks[i] = np.maximum(masks[i], masks[j])
                scores[i] = np.maximum(scores[i], scores[j])
                iskeep[j] = False
    result = dict(((k, [v[i] for i in range(n) if iskeep[i]])
                   if isinstance(v, list) else (k, v) for k, v in result.items()))
    result['num'] = int(sum([1 for i in range(n) if iskeep[i]]))
    return result


def post_process(results, maskness_threshold=0.9):
    n = results['num']
    while n > 0:
        results = post_process_one(results, maskness_threshold=maskness_threshold)
        if results['num'] < n:
            n = results['num']
        else:
            break
    return results


# ----------------------------------------------------------------------------
# Synthetic PoseSOR parameters (deterministic)
# ----------------------------------------------------------------------------
def init_params(key, C=128, nq=8, K=8, R=5, patch_in=12):
    # TODO(synk): real cfg-built backbone/neck/heads replaced by synthetic heads.
    ks = jax.random.split(key, 16)
    s = 0.1
    p = {
        'pixel_mean': jnp.array([123.675, 116.28, 103.53], jnp.float32),
        'pixel_std': jnp.array([58.395, 57.12, 57.375], jnp.float32),
        'W_bb': s * jax.random.normal(ks[0], (patch_in, C)),
        'b_bb': jnp.zeros((1, C)),
        'W_neck': s * jax.random.normal(ks[1], (C, C)),
        'b_neck': jnp.zeros((1, C)),
        'q0': s * jax.random.normal(ks[2], (nq, C)),
        'qpe0': s * jax.random.normal(ks[3], (nq, C)),
        'W_q': s * jax.random.normal(ks[4], (C, C)),
        'b_q': jnp.zeros((1, C)),
        'W_maskI': s * jax.random.normal(ks[5], (C, C)),
        'W_score': s * jax.random.normal(ks[6], (C, 1)),
        'b_score': jnp.zeros((1, 1)),
        'W_bboxI': s * jax.random.normal(ks[7], (C, 4)),
        'b_bboxI': jnp.zeros((1, 4)),
        'W_a': s * jax.random.normal(ks[8], (C, C)),
        'b_a': jnp.zeros((1, C)),
        'W_kp': s * jax.random.normal(ks[9], (C, K * 3)),
        'b_kp': jnp.zeros((1, K * 3)),
        'W_hm': s * jax.random.normal(ks[10], (C, K * C)),
        'W_maskJ': s * jax.random.normal(ks[11], (C, C)),
        'W_bboxJ': s * jax.random.normal(ks[12], (C, 4)),
        'b_bboxJ': jnp.zeros((1, 4)),
        'W_pai': s * jax.random.normal(ks[13], (C, C)),
        'b_pai': jnp.zeros((1, C)),
        'W_part': s * jax.random.normal(ks[14], (C, C)),
        'W_rank': s * jax.random.normal(ks[15], (C, R)),
        'b_rank': jnp.zeros((1, R)),
    }
    return p


def prepare_inference_params(p, cfg, patch=2):
    """One-time weight preparation: fold mean/std into the patch-embed weights,
    concatenate + lane-pad the fused head weight matrices, cast to bf16."""
    C, K, R = cfg['C'], cfg['K'], cfg['RANK']

    # fold (x - mean) * inv_std into the patch-embed weights/bias
    mean_rep = jnp.repeat(p['pixel_mean'].astype(jnp.float32), patch * patch)
    inv_std_rep = jnp.repeat(1.0 / p['pixel_std'].astype(jnp.float32), patch * patch)
    W_bb = p['W_bb'].astype(jnp.float32)
    W1 = inv_std_rep[:, None] * W_bb
    b1 = p['b_bb'].reshape(1, -1).astype(jnp.float32) \
        - (mean_rep * inv_std_rep)[None, :] @ W_bb

    # instance-seg query heads: maskI | score | bboxI  (pad to multiple of 128)
    Wq_heads = jnp.concatenate([p['W_maskI'], p['W_score'], p['W_bboxI']], axis=1)
    bq_heads = jnp.concatenate([jnp.zeros((1, C), jnp.float32),
                                p['b_score'].reshape(1, -1),
                                p['b_bboxI'].reshape(1, -1)], axis=1)
    nqh = Wq_heads.shape[1]
    nqh_pad = _round_up(nqh, 128)
    Wq_heads = jnp.pad(Wq_heads, ((0, 0), (0, nqh_pad - nqh)))
    bq_heads = jnp.pad(bq_heads, ((0, 0), (0, nqh_pad - nqh)))

    # actor heads, wide 128-aligned heads first: hm | maskJ | pai | kp | bboxJ
    Wa_heads = jnp.concatenate([p['W_hm'], p['W_maskJ'], p['W_pai'],
                                p['W_kp'], p['W_bboxJ']], axis=1)
    ba_heads = jnp.concatenate([jnp.zeros((1, K * C), jnp.float32),
                                jnp.zeros((1, C), jnp.float32),
                                p['b_pai'].reshape(1, -1),
                                p['b_kp'].reshape(1, -1),
                                p['b_bboxJ'].reshape(1, -1)], axis=1)
    nah = Wa_heads.shape[1]
    nah_pad = _round_up(nah, 128)
    Wa_heads = jnp.pad(Wa_heads, ((0, 0), (0, nah_pad - nah)))
    ba_heads = jnp.pad(ba_heads, ((0, 0), (0, nah_pad - nah)))
    offs = {'hm': 0, 'maskJ': K * C, 'pai': K * C + C,
            'kp': K * C + 2 * C, 'bboxJ': K * C + 2 * C + K * 3}

    # rank head lane-padded to 128 (-inf pad bias so softmax ignores pad lanes)
    Rp = 128
    W_rank_pad = jnp.zeros((C, Rp), jnp.float32).at[:, :R].set(p['W_rank'])
    b_rank_pad = jnp.full((1, Rp), -1e30, jnp.float32).at[:, :R].set(
        p['b_rank'].reshape(1, -1))
    rw = jnp.zeros((1, Rp), jnp.float32).at[:, :R].set(
        jnp.asarray(get_rank_weights(cfg['MAX_RANK_LEVEL'])))

    return {
        'W1': W1.astype(jnp.bfloat16), 'b1': b1.astype(jnp.float32),
        'W_neck': p['W_neck'].astype(jnp.bfloat16),
        'b_neck': p['b_neck'].reshape(1, -1).astype(jnp.float32),
        'q0': p['q0'].astype(jnp.float32), 'qpe0': p['qpe0'].astype(jnp.float32),
        'W_q': p['W_q'].astype(jnp.bfloat16),
        'b_q': p['b_q'].reshape(1, -1).astype(jnp.float32),
        'Wq_heads': Wq_heads.astype(jnp.bfloat16),
        'bq_heads': bq_heads.astype(jnp.float32),
        'W_a': p['W_a'].astype(jnp.bfloat16),
        'b_a': p['b_a'].reshape(1, -1).astype(jnp.float32),
        'Wa_heads': Wa_heads.astype(jnp.bfloat16),
        'ba_heads': ba_heads.astype(jnp.float32),
        'W_part': p['W_part'].astype(jnp.bfloat16),
        'W_rank': W_rank_pad.astype(jnp.bfloat16),
        'b_rank': b_rank_pad,
        'rank_weights': rw,
        'head_offsets': offs,
    }


# ----------------------------------------------------------------------------
# PoseSOR inference forward
# ----------------------------------------------------------------------------
def posesor_forward_eval(ip, images, cfg, rand_key):
    B, Cimg, H, W = images.shape
    C, nq, K, R = cfg['C'], cfg['NQ'], cfg['K'], cfg['RANK']
    patch = 2
    Hf, Wf = H // patch, W // patch
    HWf = Hf * Wf

    # ---- 1-3) bf16 patchify + fused (normalize->embed->relu->neck->relu) ----
    x = images.astype(jnp.bfloat16).reshape(B, Cimg, Hf, patch, Wf, patch)
    x = x.transpose(0, 2, 4, 1, 3, 5).reshape(B * HWf, Cimg * patch * patch)
    feat = pallas_embed_neck(x, ip['W1'], ip['b1'], ip['W_neck'], ip['b_neck'])
    feat_hwc = feat.reshape(B, HWf, C)                      # bf16, tokens-major

    # ---- 4) sine position embedding (tokens-major, batch-shared) ----
    pe = sine_position_embedding_hwc(C, Hf, Wf)             # (HWf, C) f32

    # ---- 5) instance seg head: fused query linear + [maskI|score|bboxI] ----
    pooled = jnp.mean(feat_hwc, axis=1, dtype=jnp.float32)  # (B, C)
    q_in = ip['q0'][None, :, :] + pooled[:, None, :]        # (B, nq, C)
    q_flat, qheads = pallas_query_heads(q_in.reshape(B * nq, C),
                                        ip['W_q'], ip['b_q'],
                                        ip['Wq_heads'], ip['bq_heads'])
    q = q_flat.reshape(B, nq, C)                            # bf16
    qm = qheads[:, 0:C].astype(jnp.bfloat16).reshape(B, nq, C)
    ins_scores = qheads[:, C:C + 1].reshape(B, nq, 1)
    ins_bboxes = qheads[:, C + 1:C + 5].reshape(B, nq, 4)
    qpe = jnp.broadcast_to(ip['qpe0'][None], (B, nq, C))

    # ---- 6) eval hit selection (data dependent -> host glue) ----
    scores_sig = np.asarray(jax.nn.sigmoid(ins_scores))     # (B, nq, 1)
    top1_threshold = scores_sig.max(axis=1, keepdims=True) - 1e-6
    loose_threshold = np.minimum(top1_threshold,
                                 np.ones_like(top1_threshold) * cfg['OBJ_THRESHOLD'])
    hits = scores_sig >= loose_threshold
    n_max = int(hits.astype(np.float32).sum(axis=1).max())
    bi, qi, _ = np.where(hits)
    ti = arange_from_ascending_seq(bi)

    # ---- 7) gather hit queries (padded qpe slots are randn like the ref) ----
    q_hit = jnp.zeros((B, n_max, C), jnp.float32)
    qpe_hit = jax.random.normal(rand_key, (B, n_max, C), jnp.float32)
    q_hit = q_hit.at[bi, ti, :].set(q[bi, qi, :].astype(jnp.float32))
    qpe_hit = qpe_hit.at[bi, ti, :].set(qpe[bi, qi, :])
    q_mask = jnp.zeros((B, n_max, 1), jnp.float32).at[bi, ti, 0].set(1.0)

    # ---- 8-9) fused actor-interaction + pose-shift + rank-score kernel ----
    offs = ip['head_offsets']
    Mh = B * n_max
    heads, pm_flat, ranks_full, rs_flat = pallas_actor_pose(
        (q_hit + qpe_hit).reshape(Mh, C),
        ip['W_a'], ip['b_a'], ip['Wa_heads'], ip['ba_heads'],
        ip['W_part'], ip['W_rank'], ip['b_rank'], ip['rank_weights'],
        pai_off=offs['pai'], C=C)
    kp_feat = heads[:, offs['hm']:offs['hm'] + K * C].reshape(B, n_max * K, C)
    jm = heads[:, offs['maskJ']:offs['maskJ'] + C].reshape(B, n_max, C)
    keypoints = heads[:, offs['kp']:offs['kp'] + K * 3].astype(jnp.float32) \
        .reshape(B, n_max, K, 3)
    j_bboxes = heads[:, offs['bboxJ']:offs['bboxJ'] + 4].astype(jnp.float32) \
        .reshape(B, n_max, 4)
    pm = pm_flat.reshape(B, n_max, C)
    ranks = ranks_full[:, :R].reshape(B, n_max, R)
    rank_scores_all = rs_flat.reshape(B, n_max)

    # ---- 10) one bmm over the feature map for qm | jm | pm | kp_feat ----
    lhs = jnp.concatenate([qm, jm, pm, kp_feat], axis=1)    # (B, nq+2n+nK, C)
    maps = pallas_bmm_nt(lhs, feat_hwc)                     # (B, ..., HWf) f32
    ins_masks = maps[:, :nq].reshape(B, nq, Hf, Wf)
    j_masks = maps[:, nq:nq + n_max].reshape(B, n_max, Hf, Wf)
    partitions = maps[:, nq + n_max:nq + 2 * n_max].reshape(B, n_max, Hf, Wf)
    heat_base = maps[:, nq + 2 * n_max:].reshape(B, n_max, K, Hf, Wf)
    # heatmaps = kp_feat @ (feat + pe)^T = (kp_feat @ feat^T) + (kp_feat @ pe^T)
    heat_pe = pallas_linear(kp_feat.reshape(Mh * K, C), pe.T,
                            out_dtype=jnp.float32)
    heatmaps = heat_base + heat_pe.reshape(B, n_max, K, Hf, Wf)

    instances_out = {'masks': ins_masks, 'scores': ins_scores, 'bboxes': ins_bboxes}
    joints_out = {'keypoints': keypoints, 'heatmaps': heatmaps,
                  'masks': j_masks, 'bboxes': j_bboxes}
    partition_out = {'partitions': partitions, 'ranks': ranks}

    # ---- 11) hoisted, batched device work for result assembly ----
    pred_masks_bin = (jax.nn.sigmoid(bilinear_resize(j_masks, (H, W))) > 0.5) \
        .astype(jnp.float32)
    hm_up = bilinear_resize(heatmaps, (H, W))               # (B, n, K, H, W)
    pred_heatmaps = pallas_softmax_rows(
        hm_up.reshape(B * n_max * K, H * W)).reshape(B, n_max, K, H, W)
    kp_coords = heatmap_argmax_coords(pred_heatmaps, H, W)  # on-device argmax
    kp_sig = jax.nn.sigmoid(keypoints)
    jbb_sig = jax.nn.sigmoid(j_bboxes)
    part_sig = jax.nn.sigmoid(bilinear_resize(partitions, (H, W)))

    # single device -> host transfer of everything the per-image loop needs
    # (full heatmaps/masks/partitions are part of the reference output contract)
    dev_outs = jax.block_until_ready(
        (rank_scores_all, pred_masks_bin, pred_heatmaps, kp_coords, kp_sig,
         jbb_sig, part_sig, q_mask, ins_scores))
    (rank_scores_np, masks_np, heatmaps_np, kp_coords_np, kp_np, jbb_np,
     part_np, q_mask_np, ins_scores_np) = [np.asarray(t) for t in dev_outs]

    pred_scores = np.zeros((B, n_max, 1), np.float32) - 1e9
    pred_scores[bi, ti] = ins_scores_np[bi, qi]

    # ---- 12) per-image result assembly (host numpy, mirrors the reference) ----
    results = []
    for i in range(B):
        masks, scores, joints, explict_joints = [], [], [], []
        partitions_l, heatmaps_l, saliency, bboxes_l = [], [], [], []
        num = 0
        for j in np.argsort(-rank_scores_np[i]):
            if q_mask_np[i, j, 0] < 0.5:     # mask check first: no exp overflow
                continue
            score = float(1.0 / (1.0 + np.exp(-pred_scores[i, j, 0])))
            pred_joints = kp_np[i, j]
            bbox = xyhw2xyxy(jbb_np[i, j][None])[0] * np.array([W, H, W, H],
                                                               np.float32)
            masks.append(masks_np[i, j])
            scores.append(score)
            joints.append(np.stack([kp_coords_np[i, j, :, 0],
                                    kp_coords_np[i, j, :, 1],
                                    pred_joints[:, -1]], axis=-1))
            explict_joints.append(pred_joints)
            heatmaps_l.append(heatmaps_np[i, j])
            partitions_l.append(part_np[i, j])
            saliency.append(float(rank_scores_np[i, j]))
            bboxes_l.append(bbox)
            num += 1
        results.append({'image_name': 'synthetic_%d' % i, 'masks': masks,
                        'scores': scores, 'joints': joints,
                        'explict_joints': explict_joints, 'heatmaps': heatmaps_l,
                        'partitions': partitions_l, 'saliency': saliency,
                        'bboxes': bboxes_l, 'num': num})
    results = [post_process(r, maskness_threshold=cfg['MASKNESS_THRESHOLD'])
               for r in results]
    return results, partition_out, joints_out, instances_out


# ----------------------------------------------------------------------------
if __name__ == "__main__":
    # C chosen as a multiple of 128 so every MXU contraction / output slab is
    # lane-dense.
    cfg = {'C': 128, 'NQ': 8, 'K': 8, 'RANK': 5, 'MAX_RANK_LEVEL': 5,
           'OBJ_THRESHOLD': 0.5, 'MASKNESS_THRESHOLD': 0.9}
    key = jax.random.PRNGKey(0)
    k_param, k_img, k_rand = jax.random.split(key, 3)
    params = init_params(k_param, C=cfg['C'], nq=cfg['NQ'], K=cfg['K'],
                         R=cfg['RANK'], patch_in=12)
    iparams = prepare_inference_params(params, cfg)

    B, H, W = 2, 32, 32
    images = jax.random.uniform(k_img, (B, 3, H, W), jnp.float32) * 255.0

    results, partition_out, joints_out, instances_out = posesor_forward_eval(
        iparams, images, cfg, k_rand)
    jax.block_until_ready((partition_out['partitions'], partition_out['ranks'],
                           joints_out['heatmaps'], instances_out['masks']))
    assert len(results) == B and all(r['num'] >= 1 for r in results)
    print("KERNEL_OK")
</pallas_src>

<mosaic_0001>
module attributes {stable_mosaic.version = 11 : i64} {
  func.func @_embed_neck_kernel(%arg0: i32, %arg1: memref<256x12xbf16, #tpu.memory_space<vmem>>, %arg2: memref<12x128xbf16, #tpu.memory_space<vmem>>, %arg3: memref<1x128xf32, #tpu.memory_space<vmem>>, %arg4: memref<128x128xbf16, #tpu.memory_space<vmem>>, %arg5: memref<1x128xf32, #tpu.memory_space<vmem>>, %arg6: memref<256x128xbf16, #tpu.memory_space<vmem>>) attributes {dimension_semantics = [#tpu.dimension_semantics<parallel>], iteration_bounds = array<i64: 2>, scalar_prefetch = 0 : i64, scratch_operands = 0 : i64, tpu.core_type = #tpu.core_type<tc>, window_params = [{transform_indices = @transform_0, window_bounds = array<i64: 256, 12>}, {pipeline_mode = #tpu.pipeline_mode<synchronous>, transform_indices = @transform_1, window_bounds = array<i64: 12, 128>}, {pipeline_mode = #tpu.pipeline_mode<synchronous>, transform_indices = @transform_2, window_bounds = array<i64: 1, 128>}, {pipeline_mode = #tpu.pipeline_mode<synchronous>, transform_indices = @transform_3, window_bounds = array<i64: 128, 128>}, {pipeline_mode = #tpu.pipeline_mode<synchronous>, transform_indices = @transform_4, window_bounds = array<i64: 1, 128>}, {transform_indices = @transform_5, window_bounds = array<i64: 256, 128>}]} {
    %c0 = arith.constant 0 : index
    %c0_0 = arith.constant 0 : index
    %0 = vector.load %arg1[%c0, %c0_0] : memref<256x12xbf16, #tpu.memory_space<vmem>>, vector<256x12xbf16>
    %c0_1 = arith.constant 0 : index
    %c0_2 = arith.constant 0 : index
    %1 = vector.load %arg2[%c0_1, %c0_2] : memref<12x128xbf16, #tpu.memory_space<vmem>>, vector<12x128xbf16>
    %cst = arith.constant dense<0.000000e+00> : vector<256x128xf32>
    %2 = tpu.matmul %0, %1, %cst {dimension_numbers = #tpu.dot_dimension_numbers<[1], [0], [0], [1], [0, 0, 1, 1], [], []>} : vector<256x12xbf16>, vector<12x128xbf16>, vector<256x128xf32> -> vector<256x128xf32>
    %c0_3 = arith.constant 0 : index
    %c0_4 = arith.constant 0 : index
    %3 = vector.load %arg3[%c0_3, %c0_4] : memref<1x128xf32, #tpu.memory_space<vmem>>, vector<1x128xf32>
    %4 = vector.broadcast %3 : vector<1x128xf32> to vector<256x128xf32>
    %5 = arith.addf %2, %4 : vector<256x128xf32>
    %cst_5 = arith.constant 0.000000e+00 : f32
    %6 = vector.broadcast %cst_5 : f32 to vector<256x128xf32>
    %7 = arith.maximumf %5, %6 : vector<256x128xf32>
    %8 = arith.truncf %7 : vector<256x128xf32> to vector<256x128xbf16>
    %c0_6 = arith.constant 0 : index
    %c0_7 = arith.constant 0 : index
    %9 = vector.load %arg4[%c0_6, %c0_7] : memref<128x128xbf16, #tpu.memory_space<vmem>>, vector<128x128xbf16>
    %cst_8 = arith.constant dense<0.000000e+00> : vector<256x128xf32>
    %10 = tpu.matmul %8, %9, %cst_8 {dimension_numbers = #tpu.dot_dimension_numbers<[1], [0], [0], [1], [0, 0, 1, 1], [], []>} : vector<256x128xbf16>, vector<128x128xbf16>, vector<256x128xf32> -> vector<256x128xf32>
    %c0_9 = arith.constant 0 : index
    %c0_10 = arith.constant 0 : index
    %11 = vector.load %arg5[%c0_9, %c0_10] : memref<1x128xf32, #tpu.memory_space<vmem>>, vector<1x128xf32>
    %12 = vector.broadcast %11 : vector<1x128xf32> to vector<256x128xf32>
    %13 = arith.addf %10, %12 : vector<256x128xf32>
    %cst_11 = arith.constant 0.000000e+00 : f32
    %14 = vector.broadcast %cst_11 : f32 to vector<256x128xf32>
    %15 = arith.maximumf %13, %14 : vector<256x128xf32>
    %16 = arith.truncf %15 : vector<256x128xf32> to vector<256x128xbf16>
    %c0_12 = arith.constant 0 : index
    %c0_13 = arith.constant 0 : index
    %17 = vector.load %arg6[%c0_12, %c0_13] : memref<256x128xbf16, #tpu.memory_space<vmem>>, vector<256x128xbf16>
    tpu.vector_store %arg6[%c0_12, %c0_13], %16 {strides = array<i32>} : memref<256x128xbf16, #tpu.memory_space<vmem>>, vector<256x128xbf16>,
    return
  }
  func.func @transform_0(%arg0: i32) -> (i32, i32) {
    %c0_i32 = arith.constant 0 : i32
    %c0_i32_0 = arith.constant 0 : i32
    return %arg0, %c0_i32 : i32, i32
  }
  func.func @transform_1(%arg0: i32) -> (i32, i32) {
    %c0_i32 = arith.constant 0 : i32
    %c0_i32_0 = arith.constant 0 : i32
    %c0_i32_1 = arith.constant 0 : i32
    return %c0_i32, %c0_i32_0 : i32, i32
  }
  func.func @transform_2(%arg0: i32) -> (i32, i32) {
    %c0_i32 = arith.constant 0 : i32
    %c0_i32_0 = arith.constant 0 : i32
    %c0_i32_1 = arith.constant 0 : i32
    return %c0_i32, %c0_i32_0 : i32, i32
  }
  func.func @transform_3(%arg0: i32) -> (i32, i32) {
    %c0_i32 = arith.constant 0 : i32
    %c0_i32_0 = arith.constant 0 : i32
    %c0_i32_1 = arith.constant 0 : i32
    return %c0_i32, %c0_i32_0 : i32, i32
  }
  func.func @transform_4(%arg0: i32) -> (i32, i32) {
    %c0_i32 = arith.constant 0 : i32
    %c0_i32_0 = arith.constant 0 : i32
    %c0_i32_1 = arith.constant 0 : i32
    return %c0_i32, %c0_i32_0 : i32, i32
  }
  func.func @transform_5(%arg0: i32) -> (i32, i32) {
    %c0_i32 = arith.constant 0 : i32
    %c0_i32_0 = arith.constant 0 : i32
    return %arg0, %c0_i32 : i32, i32
  }
}

</mosaic_0001>

<bundles_post_ra>
// kernel: tpu_custom_call.1
= control target key start
LH: loop header
LB: loop body
LE: loop exit
PB: predicated region body
PF: predicated region fallthrough
CT: control target
= control target key end

     0   :  { %10 = vsyncpa [#allocation3], 0  ;;  %s1513_s0 = inlined_call_operand.vmem [shape: bf16[512,12], index: 0, kind: input, shape index: {}]   ;;  %s1514_s1 = inlined_call_operand.vmem [shape: bf16[12,128], index: 1, kind: input, shape index: {}]   ;;  %s1515_s2 = inlined_call_operand.vmem [shape: f32[1,128], index: 2, kind: input, shape index: {}]   ;;  %s1516_s3 = inlined_call_operand.vmem [shape: bf16[128,128], index: 3, kind: input, shape index: {}]   ;;  %s1517_s4 = inlined_call_operand.vmem [shape: f32[1,128], index: 4, kind: input, shape index: {}]   ;;  %s1518_s5 = inlined_call_operand.hbm [shape: bf16[512,128], index: 5, kind: output, shape index: {}]  }
   0x1   :  { %12 = vsyncpa [#allocation3 + $0x1], 0  ;;  %s1268_s18 = smov 0   ;;  %s1270_s19 = smov 0  }
   0x2   :  { %s1272_s20 = smov 0   ;;  %s1274_s21 = smov 0  }
   0x3 LB: > { %s1289_s22 = sadd.s32 4294967295, %s1234_s21   ;;  %s871_s23 = sadd.s32 4294967294, %s1234_s21   ;;  %s1234_s21 = sphi %s1274_s21, %s1524_s21   ;;  %s1230_s20 = sphi %s1272_s20, %s1523_s20   ;;  %s1226_s19 = sphi %s1270_s19, %s1522_s19   ;;  %s1222_s18 = sphi %s1268_s18, %s1521_s18  }
   0x4   : > { %s1293_s24 = sadd.s32 1, %s1234_s21   ;;  %s135_s25 = sadd.s32 1, %s1230_s20 }
   0x5   : > { %s132_s26 = ssub.s32 %s1234_s21, %s1293_s24  ;;  %p145_p0 = scmp.ne.s32.totalorder %s1230_s20, %s1226_s19 }
   0x6   : > { %p133_p1 = scmp.eq.s32.totalorder %s132_s26, 0  ;;  %p146_p2 = scmp.eq.s32.totalorder %s1289_s22, 1 }
   0x7   : > { %p151_p3 = scmp.ne.s32.totalorder %s1226_s19, %s1222_s18  ;;  %p152_p4 = scmp.eq.s32.totalorder %s871_s23, 1 }
   0x8   : > { %s1304_s27 = scalar_select %p133_p1, %s1230_s20, %s135_s25  }
   0x9   : > { %p1306_p5 = por %p146_p2, %p145_p0  ;;  %p1310_p6 = por %p152_p4, %p151_p3 }
   0xa   : > { %p874_p7 = scmp.ge.s32.totalorder %s1234_s21, 1  ;;  %p191_p8 = scmp.lt.s32.totalorder %s1234_s21, 3 }
   0xc   : > { %p192_p9 = pnand %p874_p7, %p191_p8 }
   0xd   : > { %s876_s9 = sshll.u32 (!%p192_p9), %s1289_s22, 5  ;;  %s216_s23 = sand.u32 (!%p192_p9), 1, %s1226_s19  }
   0xe   : > { %195 = sbr.rel (%p192_p9) target bundleno = 556 (0x22c), region = 40  ;;  %p220_p10 = scmp.lt.s32.totalorder (!%p192_p9), %s876_s9, 63 }
   0xf   : > { %s875_s25 = sshll.u32 (!%p192_p9), %s216_s23, 7  ;;  %s1024_s30 = sshll.u32 (!%p192_p9), %s1289_s22, 7 }
  0x10   : > { %s1419_s26 = scalar_lea.vmem (!%p192_p9), [#allocation2], %s875_s25  ;;  %s805_s8 = scalar_lea.hbm (!%p192_p9), %s1518_s5, %s1024_s30 }
  0x11   : > { %s794_s22 = scalar_lea.sflag (!%p192_p9), [#allocation3], %s216_s23  ;;  %s1192_s16 = scalar_lea.hbm (!%p192_p9), %s1518_s5, 256 }
  0x13   : > { %v944_v0 = vld [vmem:[%s1514_s1] sm:$0xf]  ;;  %v1015_v1 = vld [vmem:[%s1514_s1] sm:$0x30]  ;;  %vm399_vm0 = vcmask 1045504   ;;  %s1526_s9 = smov (!%p220_p10, %s876_s9), 63 }
  0x14   : > { %v945_v2 = vor.u32 %v1015_v1, %v944_v0  ;;  %s877_s10 = sshll.u32 %s1526_s9, 2  ;;  %vm350_vm1 = vcmask 97280   ;;  %v1023_v9 = vld [vmem:[%s1516_s3 + $0x38] sm:$0xff]  ;;  %v1022_v11 = vld [vmem:[%s1516_s3 + $0x30] sm:$0xff]  ;;  %v1021_v12 = vld [vmem:[%s1516_s3 + $0x28] sm:$0xff]  ;;  %s806_s9 = sshll.u32 %s1419_s26, 4  ;;  %s807_s9 = int_to_ptr.vmem [resolvable:$true] %s806_s9 }
  0x15   : > { %s1326_s13 = scalar_lea.vmem %s1513_s0, %s877_s10  ;;  %608 = vmatpush.bf16.msra.mxu1 %v1023_v9  ;;  %1121 = vmatpush.bf16.msra.mxu2 %v1023_v9  ;;  %v1020_v13 = vld [vmem:[%s1516_s3 + $0x20] sm:$0xff]  ;;  %v1019_v14 = vld [vmem:[%s1516_s3 + $0x18] sm:$0xff]  ;;  %v1018_v16 = vld [vmem:[%s1516_s3 + $0x10] sm:$0xff]  ;;  %s808_s10 = sshll.u32 %s805_s8, 4  ;;  %s809_s10 = int_to_ptr.hbm [resolvable:$true] %s808_s10 }
  0x16   : > { %v401_v3 = vsel %vm399_vm0, %v945_v2, 0  ;;  %v999_v4 = vld [vmem:[%s1326_s13] sm:$0xff]  ;;  %v1000_v5 = vld [vmem:[%s1326_s13 + $0x8] sm:$0xff]  ;;  %v1001_v6 = vld [vmem:[%s1326_s13 + $0x10] sm:$0xff]  ;;  %s1186_s11 = sshra.s32 %s809_s10, 4  ;;  %s1187_s11 = int_to_ptr.hbm [resolvable:$true] %s1186_s11 }
  0x17   : > { %410 = vmatpush.bf16.msra.mxu0 %v401_v3  ;;  %1120 = vmatpush.bf16.msra.mxu3 %v401_v3  ;;  %v1002_v7 = vld [vmem:[%s1326_s13 + $0x18] sm:$0xff]  ;;  %v1003_v8 = vld [vmem:[%s1326_s13 + $0x20] sm:$0xff]  ;;  %v1004_v10 = vld [vmem:[%s1326_s13 + $0x28] sm:$0xff]  ;;  %s1188_s12 = scalar_lea.hbm %s1187_s11, 128  ;;  %p1193_p0 = scmp.lt.s32.totalorder %s1187_s11, %s1518_s5 }
  0x18   : > { %v1005_v15 = vld [vmem:[%s1326_s13 + $0x30] sm:$0xff]  ;;  %v1008_v17 = vld [vmem:[%s1326_s13 + $0x48] sm:$0xff]  ;;  %v1016_v19 = vld [vmem:[%s1516_s3] sm:$0xff]  ;;  %p1189_p11 = scmp.ne.s32.totalorder %s1187_s11, %s1188_s12  ;;  %p1194_p1 = scmp.lt.s32.totalorder %s1192_s16, %s1188_s12 }
  0x19   : > { %609 = vmatpush.bf16.msra.mxu1 %v1022_v11  ;;  %1122 = vmatpush.bf16.msra.mxu2 %v1022_v11  ;;  %v1017_v18 = vld [vmem:[%s1516_s3 + $0x8] sm:$0xff]  ;;  %v1006_v20 = vld [vmem:[%s1326_s13 + $0x38] sm:$0xff]  ;;  %v1009_v21 = vld [vmem:[%s1326_s13 + $0x50] sm:$0xff] }
  0x1a   : > { %946 = vmatmul.msk.bf16.vlgmr.msra.gmra.mxu0 %vm350_vm1, %v999_v4  ;;  %955 = vmatmul.msk.bf16.vlgmr.msra.gmra.mxu3 %vm350_vm1, %v1008_v17  ;;  %v1007_v22 = vld [vmem:[%s1326_s13 + $0x40] sm:$0xff]  ;;  %v1010_v25 = vld [vmem:[%s1326_s13 + $0x58] sm:$0xff]  ;;  %v1012_v41 = vld [vmem:[%s1326_s13 + $0x68] sm:$0xff]  ;;  %p1190_p12 = pnand %p1189_p11, %p1306_p5  ;;  %p1195_p2 = por %p1194_p1, %p1193_p0 }
  0x1b   : > { %v1376_v24 = vld [vmem:[%s1515_s2] ss:$0 sm:$0xff]  ;;  %v1013_v49 = vld [vmem:[%s1326_s13 + $0x70] sm:$0xff]  ;;  %v1014_v57 = vld [vmem:[%s1326_s13 + $0x78] sm:$0xff] }
  0x1c   : > { %v1011_v33 = vld [vmem:[%s1326_s13 + $0x60] sm:$0xff]  ;;  %p1191_p13 = pneg %p1190_p12 }
  0x1d   : > { %610 = vmatpush.bf16.msra.mxu1 %v1021_v12  ;;  %1123 = vmatpush.bf16.msra.mxu2 %v1021_v12 }
  0x1e   : > { %p1196_p3 = pnand %p1195_p2, %p1191_p13 }
  0x21   : > { %611 = vmatpush.bf16.msra.mxu1 %v1020_v13  ;;  %1124 = vmatpush.bf16.msra.mxu2 %v1020_v13 }
  0x25   : > { %612 = vmatpush.bf16.msra.mxu1 %v1019_v14  ;;  %1125 = vmatpush.bf16.msra.mxu2 %v1019_v14 }
  0x29   : > { %613 = vmatpush.bf16.msra.mxu1 %v1018_v16  ;;  %1126 = vmatpush.bf16.msra.mxu2 %v1018_v16 }
  0x2a   : > { %947 = vmatmul.msk.bf16.gmra.mxu0 %vm350_vm1, %v1000_v5  ;;  %956 = vmatmul.msk.bf16.gmra.mxu3 %vm350_vm1, %v1009_v21 }
  0x2d   : > { %614 = vmatpush.bf16.msra.mxu1 %v1017_v18  ;;  %1127 = vmatpush.bf16.msra.mxu2 %v1017_v18 }
  0x31   : > { %615 = vmatpush.bf16.msra.mxu1 %v1016_v19  ;;  %1128 = vmatpush.bf16.msra.mxu2 %v1016_v19 }
  0x3a   : > { %948 = vmatmul.msk.bf16.gmra.mxu0 %vm350_vm1, %v1001_v6  ;;  %957 = vmatmul.msk.bf16.gmra.mxu3 %vm350_vm1, %v1010_v25 }
  0x4a   : > { %949 = vmatmul.msk.bf16.gmra.mxu0 %vm350_vm1, %v1002_v7  ;;  %958 = vmatmul.msk.bf16.gmra.mxu3 %vm350_vm1, %v1011_v33 }
  0x5a   : > { %950 = vmatmul.msk.bf16.gmra.mxu0 %vm350_vm1, %v1003_v8  ;;  %959 = vmatmul.msk.bf16.gmra.mxu3 %vm350_vm1, %v1012_v41 }
  0x6a   : > { %951 = vmatmul.msk.bf16.gmra.mxu0 %vm350_vm1, %v1004_v10  ;;  %960 = vmatmul.msk.bf16.gmra.mxu3 %vm350_vm1, %v1013_v49 }
  0x7a   : > { %952 = vmatmul.msk.bf16.gmra.mxu0 %vm350_vm1, %v1005_v15  ;;  %961 = vmatmul.msk.bf16.gmra.mxu3 %vm350_vm1, %v1014_v57 }
  0x8a   : > { %953 = vmatmul.msk.bf16.gmra.mxu0 %vm350_vm1, %v1006_v20 }
  0x97   : > { %v412_v23 = vpop.f32.mrf.mxu0 }
  0x98   : > { %v413_v26 = vadd.f32 %v1376_v24, %v412_v23 }
  0x9a   : > { %954 = vmatmul.msk.bf16.gmra.mxu0 %vm350_vm1, %v1007_v22  ;;  %v492_v29 = vmax.f32 %v413_v26, 0.0 }
  0x9d   : > { %v457_v15 = vpop.f32.mrf.mxu3 }
  0x9f   : > { %v414_v27 = vpop.f32.mrf.mxu0 }
  0xa0   : > { %v415_v28 = vadd.f32 %v1376_v24, %v414_v27 }
  0xa2   : > { %v493_v30 = vmax.f32 %v415_v28, 0.0 }
  0xa4   : > { %v524_v31 = vpack.c.bf16 %v493_v30, %v492_v29 }
  0xa5   : > { %v459_v19 = vpop.f32.mrf.mxu3 }
  0xa6   : > { %616 = vmatmul.bf16.vlgmr.msra.gmra.mxu1 %v524_v31 }
  0xa7   : > { %v417_v32 = vpop.f32.mrf.mxu0 }
  0xa8   : > { %v418_v34 = vadd.f32 %v1376_v24, %v417_v32 }
  0xaa   : > { %v494_v37 = vmax.f32 %v418_v34, 0.0  ;;  %v1410_v34 = vld [vmem:[%s1517_s4] ss:$0 sm:$0xff] }
  0xad   : > { %v462_v25 = vpop.f32.mrf.mxu3 }
  0xaf   : > { %v419_v35 = vpop.f32.mrf.mxu0 }
  0xb0   : > { %v420_v36 = vadd.f32 %v1376_v24, %v419_v35 }
  0xb2   : > { %v495_v38 = vmax.f32 %v420_v36, 0.0 }
  0xb4   : > { %v525_v39 = vpack.c.bf16 %v495_v38, %v494_v37  ;;  %v458_v37 = vadd.f32 %v1376_v24, %v457_v15  ;;  %v460_v38 = vadd.f32 %v1376_v24, %v459_v19 }
  0xb5   : > { %v464_v33 = vpop.f32.mrf.mxu3 }
  0xb6   : > { %621 = vmatmul.bf16.gmra.mxu1 %v525_v39 }
  0xb7   : > { %v422_v40 = vpop.f32.mrf.mxu0 }
  0xb8   : > { %v423_v42 = vadd.f32 %v1376_v24, %v422_v40 }
  0xba   : > { %v496_v45 = vmax.f32 %v423_v42, 0.0 }
  0xbd   : > { %v467_v42 = vpop.f32.mrf.mxu3 }
  0xbf   : > { %v424_v43 = vpop.f32.mrf.mxu0 }
  0xc0   : > { %v425_v44 = vadd.f32 %v1376_v24, %v424_v43  ;;  %v510_v43 = vmax.f32 %v458_v37, 0.0 }
  0xc2   : > { %v497_v46 = vmax.f32 %v425_v44, 0.0  ;;  %v511_v44 = vmax.f32 %v460_v38, 0.0 }
  0xc4   : > { %v526_v47 = vpack.c.bf16 %v497_v46, %v496_v45 }
  0xc6   : > { %626 = vmatmul.bf16.gmra.mxu1 %v526_v47  ;;  %v533_v47 = vpack.c.bf16 %v511_v44, %v510_v43 }
  0xc7   : > { %v427_v48 = vpop.f32.mrf.mxu0 }
  0xc8   : > { %v428_v50 = vadd.f32 %v1376_v24, %v427_v48  ;;  %v469_v48 = vpop.f32.mrf.mxu3 }
  0xca   : > { %v498_v53 = vmax.f32 %v428_v50, 0.0 }
  0xcf   : > { %v429_v51 = vpop.f32.mrf.mxu0 }
  0xd0   : > { %v430_v52 = vadd.f32 %v1376_v24, %v429_v51  ;;  %v463_v51 = vadd.f32 %v1376_v24, %v462_v25 }
  0xd2   : > { %v499_v54 = vmax.f32 %v430_v52, 0.0  ;;  %v465_v52 = vadd.f32 %v1376_v24, %v464_v33 }
  0xd4   : > { %v527_v55 = vpack.c.bf16 %v499_v54, %v498_v53  ;;  %v513_v57 = vmax.f32 %v465_v52, 0.0 }
  0xd6   : > { %631 = vmatmul.bf16.gmra.mxu1 %v527_v55 }
  0xd7   : > { %v432_v56 = vpop.f32.mrf.mxu0 }
  0xd8   : > { %v433_v58 = vadd.f32 %v1376_v24, %v432_v56  ;;  %v512_v56 = vmax.f32 %v463_v51, 0.0 }
  0xda   : > { %v500_v61 = vmax.f32 %v433_v58, 0.0 }
  0xdf   : > { %v434_v59 = vpop.f32.mrf.mxu0 }
  0xe0   : > { %v435_v60 = vadd.f32 %v1376_v24, %v434_v59 }
  0xe2   : > { %v501_v62 = vmax.f32 %v435_v60, 0.0  ;;  %v472_v60 = vpop.f32.mrf.mxu3 }
  0xe4   : > { %v528_v63 = vpack.c.bf16 %v501_v62, %v500_v61  ;;  %v534_v61 = vpack.c.bf16 %v513_v57, %v512_v56 }
  0xe6   : > { %636 = vmatmul.bf16.gmra.mxu1 %v528_v63 }
  0xe7   : > { %v437_v0 = vpop.f32.mrf.mxu0 }
  0xe8   : > { %v438_v1 = vadd.f32 %v1376_v24, %v437_v0  ;;  %v468_v0 = vadd.f32 %v1376_v24, %v467_v42 }
  0xea   : > { %v502_v4 = vmax.f32 %v438_v1, 0.0  ;;  %v470_v1 = vadd.f32 %v1376_v24, %v469_v48 }
  0xef   : > { %v439_v2 = vpop.f32.mrf.mxu0 }
  0xf0   : > { %v440_v3 = vadd.f32 %v1376_v24, %v439_v2 }
  0xf2   : > { %v503_v5 = vmax.f32 %v440_v3, 0.0  ;;  %v474_v3 = vpop.f32.mrf.mxu3 }
  0xf3   : > { %v475_v15 = vadd.f32 %v1376_v24, %v474_v3 }
  0xf4   : > { %v529_v6 = vpack.c.bf16 %v503_v5, %v502_v4 }
  0xf6   : > { %641 = vmatmul.bf16.gmra.mxu1 %v529_v6  ;;  %v514_v6 = vmax.f32 %v468_v0, 0.0 }
  0xf7   : > { %v442_v7 = vpop.f32.mrf.mxu0 }
  0xf8   : > { %v443_v8 = vadd.f32 %v1376_v24, %v442_v7  ;;  %v515_v7 = vmax.f32 %v470_v1, 0.0 }
  0xfa   : > { %v504_v11 = vmax.f32 %v443_v8, 0.0 }
  0xff   : > { %v444_v9 = vpop.f32.mrf.mxu0 }
 0x100   : > { %v445_v10 = vadd.f32 %v1376_v24, %v444_v9 }
 0x102   : > { %v505_v12 = vmax.f32 %v445_v10, 0.0  ;;  %v535_v10 = vpack.c.bf16 %v515_v7, %v514_v6 }
 0x104   : > { %v530_v13 = vpack.c.bf16 %v505_v12, %v504_v11  ;;  %v477_v11 = vpop.f32.mrf.mxu3 }
 0x106   : > { %646 = vmatmul.bf16.gmra.mxu1 %v530_v13 }
 0x107   : > { %v447_v14 = vpop.f32.mrf.mxu0 }
 0x108   : > { %v448_v16 = vadd.f32 %v1376_v24, %v447_v14  ;;  %v473_v14 = vadd.f32 %v1376_v24, %v472_v60 }
 0x10a   : > { %v506_v20 = vmax.f32 %v448_v16, 0.0  ;;  %v516_v19 = vmax.f32 %v473_v14, 0.0 }
 0x10f   : > { %v449_v17 = vpop.f32.mrf.mxu0 }
 0x110   : > { %v450_v18 = vadd.f32 %v1376_v24, %v449_v17 }
 0x112   : > { %v507_v21 = vmax.f32 %v450_v18, 0.0 }
 0x114   : > { %v531_v22 = vpack.c.bf16 %v507_v21, %v506_v20  ;;  %v517_v20 = vmax.f32 %v475_v15, 0.0 }
 0x116   : > { %651 = vmatmul.bf16.gmra.mxu1 %v531_v22  ;;  %v479_v22 = vpop.f32.mrf.mxu3  ;;  %v536_v25 = vpack.c.bf16 %v517_v20, %v516_v19 }
 0x117   : > { %v452_v23 = vpop.f32.mrf.mxu0 }
 0x118   : > { %v453_v26 = vadd.f32 %v1376_v24, %v452_v23 }
 0x11a   : > { %v508_v29 = vmax.f32 %v453_v26, 0.0 }
 0x11f   : > { %v454_v27 = vpop.f32.mrf.mxu0 }
 0x120   : > { %v455_v28 = vadd.f32 %v1376_v24, %v454_v27 }
 0x122   : > { %v509_v30 = vmax.f32 %v455_v28, 0.0  ;;  %v482_v28 = vpop.f32.mrf.mxu3 }
 0x123   : > { %v617_v31 = vpop.f32.mrf.mxu1  ;;  %v483_v43 = vadd.f32 %v1376_v24, %v482_v28 }
 0x124   : > { %v532_v32 = vpack.c.bf16 %v509_v30, %v508_v29  ;;  %v618_v35 = vadd.f32 %v1410_v34, %v617_v31  ;;  %v478_v29 = vadd.f32 %v1376_v24, %v477_v11  ;;  %v480_v30 = vadd.f32 %v1376_v24, %v479_v22 }
 0x126   : > { %656 = vmatmul.bf16.vlgmr.msra.gmra.mxu2 %v532_v32  ;;  %v697_v40 = vmax.f32 %v618_v35, 0.0  ;;  %v518_v35 = vmax.f32 %v478_v29, 0.0 }
 0x12b   : > { %v619_v36 = vpop.f32.mrf.mxu1 }
 0x12c   : > { %v620_v39 = vadd.f32 %v1410_v34, %v619_v36  ;;  %v519_v36 = vmax.f32 %v480_v30, 0.0 }
 0x12e   : > { %v698_v41 = vmax.f32 %v620_v39, 0.0  ;;  %v537_v39 = vpack.c.bf16 %v519_v36, %v518_v35 }
 0x130   : > { %v1028_v45 = vpack.c.bf16 %v698_v41, %v697_v40  ;;  %v484_v40 = vpop.f32.mrf.mxu3 }
 0x131   : > { %v485_v44 = vadd.f32 %v1376_v24, %v484_v40 }
 0x132   : > { %1029 = vst [vmem:[%s1419_s26] sm:$0xff] %v1028_v45  }
 0x133   : > { %v622_v46 = vpop.f32.mrf.mxu1 }
 0x134   : > { %v623_v49 = vadd.f32 %v1410_v34, %v622_v46 }
 0x136   : > { %661 = vmatmul.bf16.gmra.mxu2 %v533_v47  ;;  %v699_v54 = vmax.f32 %v623_v49, 0.0  ;;  %v520_v49 = vmax.f32 %v483_v43, 0.0 }
 0x138   : > { %v487_v48 = vpop.f32.mrf.mxu3 }
 0x139   : > { %v488_v57 = vadd.f32 %v1376_v24, %v487_v48 }
 0x13b   : > { %v624_v50 = vpop.f32.mrf.mxu1 }
 0x13c   : > { %v625_v53 = vadd.f32 %v1410_v34, %v624_v50  ;;  %v521_v50 = vmax.f32 %v485_v44, 0.0 }
 0x13e   : > { %v700_v55 = vmax.f32 %v625_v53, 0.0  ;;  %v538_v53 = vpack.c.bf16 %v521_v50, %v520_v49 }
 0x140   : > { %v1033_v58 = vpack.c.bf16 %v700_v55, %v699_v54  ;;  %v489_v54 = vpop.f32.mrf.mxu3 }
 0x142   : > { %1105 = vst [vmem:[%s1419_s26 + $0x8] sm:$0xff] %v1033_v58   ;;  %v490_v58 = vadd.f32 %v1376_v24, %v489_v54 }
 0x143   : > { %v627_v59 = vpop.f32.mrf.mxu1 }
 0x144   : > { %v628_v62 = vadd.f32 %v1410_v34, %v627_v59 }
 0x146   : > { %666 = vmatmul.bf16.gmra.mxu2 %v534_v61  ;;  %v701_v4 = vmax.f32 %v628_v62, 0.0  ;;  %v522_v62 = vmax.f32 %v488_v57, 0.0 }
 0x14b   : > { %v629_v63 = vpop.f32.mrf.mxu1 }
 0x14c   : > { %v630_v2 = vadd.f32 %v1410_v34, %v629_v63  ;;  %v523_v63 = vmax.f32 %v490_v58, 0.0 }
 0x14e   : > { %v702_v5 = vmax.f32 %v630_v2, 0.0  ;;  %v539_v2 = vpack.c.bf16 %v523_v63, %v522_v62 }
 0x150   : > { %v1038_v8 = vpack.c.bf16 %v702_v5, %v701_v4 }
 0x152   : > { %1106 = vst [vmem:[%s1419_s26 + $0x10] sm:$0xff] %v1038_v8  }
 0x153   : > { %v632_v9 = vpop.f32.mrf.mxu1 }
 0x154   : > { %v633_v12 = vadd.f32 %v1410_v34, %v632_v9 }
 0x156   : > { %671 = vmatmul.bf16.gmra.mxu2 %v535_v10  ;;  %v703_v17 = vmax.f32 %v633_v12, 0.0 }
 0x15b   : > { %v634_v13 = vpop.f32.mrf.mxu1 }
 0x15c   : > { %v635_v16 = vadd.f32 %v1410_v34, %v634_v13 }
 0x15e   : > { %v704_v18 = vmax.f32 %v635_v16, 0.0 }
 0x160   : > { %v1043_v21 = vpack.c.bf16 %v704_v18, %v703_v17 }
 0x162   : > { %1107 = vst [vmem:[%s1419_s26 + $0x18] sm:$0xff] %v1043_v21  }
 0x163   : > { %v637_v23 = vpop.f32.mrf.mxu1 }
 0x164   : > { %v638_v26 = vadd.f32 %v1410_v34, %v637_v23 }
 0x166   : > { %676 = vmatmul.bf16.gmra.mxu2 %v536_v25  ;;  %v705_v32 = vmax.f32 %v638_v26, 0.0 }
 0x16b   : > { %v639_v27 = vpop.f32.mrf.mxu1 }
 0x16c   : > { %v640_v31 = vadd.f32 %v1410_v34, %v639_v27 }
 0x16e   : > { %v706_v33 = vmax.f32 %v640_v31, 0.0 }
 0x170   : > { %v1048_v37 = vpack.c.bf16 %v706_v33, %v705_v32 }
 0x172   : > { %1108 = vst [vmem:[%s1419_s26 + $0x20] sm:$0xff] %v1048_v37  }
 0x173   : > { %v642_v38 = vpop.f32.mrf.mxu1 }
 0x174   : > { %v643_v41 = vadd.f32 %v1410_v34, %v642_v38 }
 0x176   : > { %681 = vmatmul.bf16.gmra.mxu2 %v537_v39  ;;  %v707_v46 = vmax.f32 %v643_v41, 0.0 }
 0x17b   : > { %v644_v42 = vpop.f32.mrf.mxu1 }
 0x17c   : > { %v645_v45 = vadd.f32 %v1410_v34, %v644_v42 }
 0x17e   : > { %v708_v47 = vmax.f32 %v645_v45, 0.0 }
 0x180   : > { %v1053_v51 = vpack.c.bf16 %v708_v47, %v707_v46 }
 0x182   : > { %1109 = vst [vmem:[%s1419_s26 + $0x28] sm:$0xff] %v1053_v51  }
 0x183   : > { %v647_v52 = vpop.f32.mrf.mxu1 }
 0x184   : > { %v648_v55 = vadd.f32 %v1410_v34, %v647_v52 }
 0x186   : > { %686 = vmatmul.bf16.gmra.mxu2 %v538_v53  ;;  %v709_v60 = vmax.f32 %v648_v55, 0.0 }
 0x18b   : > { %v649_v56 = vpop.f32.mrf.mxu1 }
 0x18c   : > { %v650_v59 = vadd.f32 %v1410_v34, %v649_v56 }
 0x18e   : > { %v710_v61 = vmax.f32 %v650_v59, 0.0 }
 0x190   : > { %v1058_v0 = vpack.c.bf16 %v710_v61, %v709_v60 }
 0x192   : > { %1110 = vst [vmem:[%s1419_s26 + $0x30] sm:$0xff] %v1058_v0  }
 0x193   : > { %v652_v1 = vpop.f32.mrf.mxu1 }
 0x194   : > { %v653_v3 = vadd.f32 %v1410_v34, %v652_v1 }
 0x196   : > { %691 = vmatmul.bf16.gmra.mxu2 %v539_v2  ;;  %v711_v6 = vmax.f32 %v653_v3, 0.0 }
 0x19b   : > { %v654_v4 = vpop.f32.mrf.mxu1 }
 0x19c   : > { %v655_v5 = vadd.f32 %v1410_v34, %v654_v4 }
 0x19e   : > { %v712_v24 = vmax.f32 %v655_v5, 0.0 }
 0x1a0   : > { %v1063_v7 = vpack.c.bf16 %v712_v24, %v711_v6 }
 0x1a2   : > { %1111 = vst [vmem:[%s1419_s26 + $0x38] sm:$0xff] %v1063_v7  }
 0x1a9   : > { %v657_v8 = vpop.f32.mrf.mxu2 }
 0x1aa   : > { %v658_v9 = vadd.f32 %v1410_v34, %v657_v8 }
 0x1ac   : > { %v713_v12 = vmax.f32 %v658_v9, 0.0 }
 0x1b1   : > { %v659_v10 = vpop.f32.mrf.mxu2 }
 0x1b2   : > { %v660_v11 = vadd.f32 %v1410_v34, %v659_v10 }
 0x1b4   : > { %v714_v13 = vmax.f32 %v660_v11, 0.0 }
 0x1b6   : > { %v1068_v14 = vpack.c.bf16 %v714_v13, %v713_v12 }
 0x1b8   : > { %1112 = vst [vmem:[%s1419_s26 + $0x40] sm:$0xff] %v1068_v14  }
 0x1b9   : > { %v662_v15 = vpop.f32.mrf.mxu2 }
 0x1ba   : > { %v663_v16 = vadd.f32 %v1410_v34, %v662_v15 }
 0x1bc   : > { %v715_v19 = vmax.f32 %v663_v16, 0.0 }
 0x1c1   : > { %v664_v17 = vpop.f32.mrf.mxu2 }
 0x1c2   : > { %v665_v18 = vadd.f32 %v1410_v34, %v664_v17 }
 0x1c4   : > { %v716_v20 = vmax.f32 %v665_v18, 0.0 }
 0x1c6   : > { %v1073_v21 = vpack.c.bf16 %v716_v20, %v715_v19 }
 0x1c8   : > { %1113 = vst [vmem:[%s1419_s26 + $0x48] sm:$0xff] %v1073_v21  }
 0x1c9   : > { %v667_v22 = vpop.f32.mrf.mxu2 }
 0x1ca   : > { %v668_v23 = vadd.f32 %v1410_v34, %v667_v22 }
 0x1cc   : > { %v717_v27 = vmax.f32 %v668_v23, 0.0 }
 0x1d1   : > { %v669_v25 = vpop.f32.mrf.mxu2 }
 0x1d2   : > { %v670_v26 = vadd.f32 %v1410_v34, %v669_v25 }
 0x1d4   : > { %v718_v28 = vmax.f32 %v670_v26, 0.0 }
 0x1d6   : > { %v1078_v29 = vpack.c.bf16 %v718_v28, %v717_v27 }
 0x1d8   : > { %1114 = vst [vmem:[%s1419_s26 + $0x50] sm:$0xff] %v1078_v29  }
 0x1d9   : > { %v672_v30 = vpop.f32.mrf.mxu2 }
 0x1da   : > { %v673_v31 = vadd.f32 %v1410_v34, %v672_v30 }
 0x1dc   : > { %v719_v35 = vmax.f32 %v673_v31, 0.0 }
 0x1e1   : > { %v674_v32 = vpop.f32.mrf.mxu2 }
 0x1e2   : > { %v675_v33 = vadd.f32 %v1410_v34, %v674_v32 }
 0x1e4   : > { %v720_v36 = vmax.f32 %v675_v33, 0.0 }
 0x1e6   : > { %v1083_v37 = vpack.c.bf16 %v720_v36, %v719_v35 }
 0x1e8   : > { %1115 = vst [vmem:[%s1419_s26 + $0x58] sm:$0xff] %v1083_v37  }
 0x1e9   : > { %v677_v38 = vpop.f32.mrf.mxu2 }
 0x1ea   : > { %v678_v39 = vadd.f32 %v1410_v34, %v677_v38 }
 0x1ec   : > { %v721_v42 = vmax.f32 %v678_v39, 0.0 }
 0x1f1   : > { %v679_v40 = vpop.f32.mrf.mxu2 }
 0x1f2   : > { %v680_v41 = vadd.f32 %v1410_v34, %v679_v40 }
 0x1f4   : > { %v722_v43 = vmax.f32 %v680_v41, 0.0 }
 0x1f6   : > { %v1088_v44 = vpack.c.bf16 %v722_v43, %v721_v42 }
 0x1f8   : > { %1116 = vst [vmem:[%s1419_s26 + $0x60] sm:$0xff] %v1088_v44  }
 0x1f9   : > { %v682_v45 = vpop.f32.mrf.mxu2 }
 0x1fa   : > { %v683_v46 = vadd.f32 %v1410_v34, %v682_v45 }
 0x1fc   : > { %v723_v49 = vmax.f32 %v683_v46, 0.0 }
 0x201   : > { %v684_v47 = vpop.f32.mrf.mxu2 }
 0x202   : > { %v685_v48 = vadd.f32 %v1410_v34, %v684_v47 }
 0x204   : > { %v724_v50 = vmax.f32 %v685_v48, 0.0 }
 0x206   : > { %v1093_v51 = vpack.c.bf16 %v724_v50, %v723_v49 }
 0x208   : > { %1117 = vst [vmem:[%s1419_s26 + $0x68] sm:$0xff] %v1093_v51  }
 0x209   : > { %v687_v52 = vpop.f32.mrf.mxu2 }
 0x20a   : > { %v688_v53 = vadd.f32 %v1410_v34, %v687_v52 }
 0x20c   : > { %v725_v56 = vmax.f32 %v688_v53, 0.0 }
 0x211   : > { %v689_v54 = vpop.f32.mrf.mxu2 }
 0x212   : > { %v690_v55 = vadd.f32 %v1410_v34, %v689_v54 }
 0x214   : > { %v726_v57 = vmax.f32 %v690_v55, 0.0 }
 0x216   : > { %v1098_v58 = vpack.c.bf16 %v726_v57, %v725_v56 }
 0x218   : > { %1118 = vst [vmem:[%s1419_s26 + $0x70] sm:$0xff] %v1098_v58  }
 0x219   : > { %v692_v59 = vpop.f32.mrf.mxu2 }
 0x21a   : > { %v693_v60 = vadd.f32 %v1410_v34, %v692_v59 }
 0x21c   : > { %v727_v63 = vmax.f32 %v693_v60, 0.0 }
 0x221   : > { %v694_v61 = vpop.f32.mrf.mxu2 }
 0x222   : > { %v695_v62 = vadd.f32 %v1410_v34, %v694_v61 }
 0x224   : > { %v728_v0 = vmax.f32 %v695_v62, 0.0 }
 0x226   : > { %v1103_v1 = vpack.c.bf16 %v728_v0, %v727_v63 }
 0x228   : > { %1119 = vst [vmem:[%s1419_s26 + $0x78] sm:$0xff] %v1103_v1  }
 0x229   : > { %1199 = shalt.err (!%p1196_p3)
}
 0x22a   : > { %s1236_s23 = smov 64   ;;  %s1237_s25 = smov 4  }
 0x22b   : > { %1129 = dma.vmem_to_hbm [thread:$0]  (%p1306_p5), %s807_s9, 2048, %s809_s10, %s794_s22, %s1236_s23, %s1236_s23, %s1237_s25  }
 0x22c PF: > { %p1135_p4 = scmp.ge.s32.totalorder %s1234_s21, 2  ;;  %s823_s26 = sand.u32 1, %s1222_s18  }
 0x22d   : > { %s824_s30 = scalar_lea.sflag [#allocation3], %s823_s26 }
 0x22e   : > { %p1132_p7 = pnand %p1135_p4, %p1310_p6 }
 0x230   : > { %p1133_p8 = pneg %p1132_p7 }
 0x232   : > { %1217 = dma.done.wait (%p1133_p8), %s824_s30, 2048  }
 0x233   : > { %1219 = vsyncadd (%p1133_p8), %s824_s30, 4294965248  ;;  %p15_p9 = scmp.ge.s32.totalorder %s1293_s24, 4   ;;  %s1521_s18 = smov %s1226_s19 }
 0x234   : > { %s1522_s19 = smov %s1230_s20  ;;  %s1523_s20 = smov %s1304_s27 }
 0x235   : > { %s1524_s21 = smov %s1293_s24  ;;  %17 = sbr.rel (!%p15_p9) target bundleno = 3 (0x3), region = 75 }
 0x23a   :  { %830 = vsyncpa [#allocation3], 1 }
 0x23b   :  { %832 = vsyncpa [#allocation3 + $0x1], 1 }

</bundles_post_ra>
